<compile_context>
chip_gen: v7x
topology: tpu7x:2x2x1
jax: 0.10.0
libtpu: 0.0.40
codegen_flags: <defaults>
</compile_context>

<pallas_src>
import functools
import numpy as np
import jax
import jax.numpy as jnp
from jax.experimental import pallas as pl
from jax.experimental.pallas import tpu as pltpu


# ---------------------------------------------------------------------------
# Parameter init (matches the PyTorch module's deterministic init).
# ---------------------------------------------------------------------------
def init_upsample_params(upsample_scales, freq_axis_kernel_size=1):
    """conv.weight.data.fill_(1/prod(k_size)) then weight_norm (identity at init)."""
    assert freq_axis_kernel_size == 1  # TODO(synk): freq_axis_kernel_size > 1 unsupported
    weights = []
    for s in upsample_scales:
        k_size = (freq_axis_kernel_size, 2 * int(s) + 1)
        v = np.full(k_size, 1.0 / np.prod(k_size), dtype=np.float32)
        norm = np.linalg.norm(v.astype(np.float64))
        w_eff = (np.float32(norm) * v / np.float32(norm)).astype(np.float32)
        weights.append(w_eff.reshape(-1))  # time taps (freq kernel size is 1)
    return weights


# ---------------------------------------------------------------------------
# Exact layered reference (numpy / float64).  Also used at setup time to read
# off the fused FIR coefficients via impulse responses (the network is linear).
# ---------------------------------------------------------------------------
def _layered_ref_rows(x_rows, scales, weights):
    x = np.asarray(x_rows, dtype=np.float64)
    for s, w in zip(scales, weights):
        s = int(s)
        w = np.asarray(w, dtype=np.float64).reshape(-1)
        up = np.repeat(x, s, axis=-1)                 # Stretch2d(s, 1, 'nearest')
        padu = np.pad(up, ((0, 0), (s, s)))           # Conv2d padding=(0, s)
        out = np.zeros_like(up)
        for k in range(2 * s + 1):
            out += w[k] * padu[:, k:k + up.shape[1]]
        x = out
    return x


def upsample_network_ref(c, upsample_scales, conv_weights):
    x = np.asarray(c, dtype=np.float64)
    B, C, T = x.shape
    y = _layered_ref_rows(x.reshape(B * C, T), upsample_scales, conv_weights)
    return y.reshape(B, C, -1)


# ---------------------------------------------------------------------------
# Setup-time (numpy) helpers: stencil radius, tiling, fused coefficients.
# ---------------------------------------------------------------------------
def _stencil_radius(scales):
    """Radius (in input frames) of the composite stencil of the whole stack."""
    e = 0
    for s in reversed([int(v) for v in scales]):
        e = (e - 1) // s + 2
    return e


def _choose_frame_block(T, P, L, target_lanes=1024, max_frames=256):
    """Frames per output tile: must divide T and give a lane-dense (multiple of
    128) or full-width output block."""
    min_f = min(T, L + 1)
    cands = []
    for d in range(1, T + 1):
        if T % d:
            continue
        if d < min_f:
            continue
        if d != T and ((d * P) % 128 != 0 or d > max_frames):
            continue
        cands.append(d)

    def score(d):
        lanes = d * P
        return (0 if lanes % 128 == 0 else 1, abs(lanes - target_lanes), d)

    return min(cands, key=score)


def _choose_row_block(R_pad, Kp, F, P, taps, use_matmul,
                      max_rows=256, vmem_budget=10 * 1024 * 1024):
    """Largest row block (multiple of 8, divides R_pad) within a VMEM budget."""
    per_variant = Kp * F * P if use_matmul else F * taps * P
    coef_bytes = 2 * 4 * per_variant              # double-buffered coefficients
    best = 8
    for rb in range(8, min(R_pad, max_rows) + 1, 8):
        if R_pad % rb:
            continue
        foot = coef_bytes + 4 * (2 * rb * Kp      # input windows (x2 buffers)
                                 + 2 * rb * F * P)  # output tiles (x2 buffers)
        if foot <= vmem_budget:
            best = rb
    return best


def _build_per_frame_coeffs(T, F, L, scales, weights):
    """Per-frame fused FIR coefficients, 3 variants [interior, first, last].

    Returns float32 (3, F, taps, P) with coef[v, g, t, q] = coefficient of
    x[i_g + t - L] in y[P*i_g + q] for the g-th frame of that block variant.
    """
    scales = [int(s) for s in scales]
    P = int(np.prod(scales))
    taps = 2 * L + 1
    W_map = L + 1
    T_cap = 6 * L + 16
    T_probe = T if T <= T_cap else T_cap

    # Impulse responses: row m of the probe output = response to x = e_m.
    resp = _layered_ref_rows(np.eye(T_probe, dtype=np.float64), scales, weights)

    def frame_kernel(ip):
        fk = np.zeros((taps, P), dtype=np.float64)
        for t in range(taps):
            m = ip + t - L
            if 0 <= m < T_probe:
                fk[t, :] = resp[m, P * ip:P * (ip + 1)]
        return fk

    def probe_frame(i):
        if T <= T_cap:
            return i
        if i < W_map:
            return i                      # left-edge frames (exact)
        if i >= T - W_map:
            return T_probe - (T - i)      # right-edge frames (exact)
        return T_probe // 2               # interior (shift invariant)

    nfb = T // F
    first = np.stack([frame_kernel(probe_frame(g)) for g in range(F)])
    last = np.stack([frame_kernel(probe_frame(T - F + g)) for g in range(F)])
    i_int = F if nfb >= 3 else 0          # interior variant unused when nfb < 3
    interior = np.stack([frame_kernel(probe_frame(i_int))] * F)
    return np.stack([interior, first, last]).astype(np.float32)   # (3,F,taps,P)


def _build_band_matrices(coef, Kp):
    """Banded matmul operand: band[v, m, g*P+q] = coef[v, g, m-g, q] (0 elsewhere)."""
    nvar, F, taps, P = coef.shape
    band = np.zeros((nvar, Kp, F * P), dtype=np.float32)
    for v in range(nvar):
        for g in range(F):
            band[v, g:g + taps, g * P:(g + 1) * P] = coef[v, g]
    return band


# ---------------------------------------------------------------------------
# Pallas kernels.
# ---------------------------------------------------------------------------
def _upsample_matmul_kernel(vids_ref, x_ref, band_ref, o_ref):
    """x_ref   : (1, rb, Kp)      windowed input frames (with halo) for this block.
       band_ref: (1, Kp, F*P)     banded fused FIR coefficients (one variant).
       o_ref   : (rb, F*P)        interleaved output tile (phases contiguous)."""
    del vids_ref
    o_ref[...] = jnp.dot(
        x_ref[0], band_ref[0],
        preferred_element_type=jnp.float32,
        precision=jax.lax.Precision.HIGHEST,
    ).astype(o_ref.dtype)


def _upsample_taps_kernel(vids_ref, x_ref, coef_ref, o_ref, *, F, taps, P):
    """VPU fallback for configs where the banded matrix would be too large."""
    del vids_ref
    xw = x_ref[0]                                      # (rb, Kp)
    c = coef_ref[0]                                    # (F*taps, P)
    for g in range(F):                                 # static unroll
        b = g * taps
        acc = xw[:, g:g + 1] * c[b:b + 1, :]
        for t in range(1, taps):
            acc = acc + xw[:, g + t:g + t + 1] * c[b + t:b + t + 1, :]
        o_ref[:, g * P:(g + 1) * P] = acc.astype(o_ref.dtype)


# ---------------------------------------------------------------------------
# Forward wrapper: c (B, C, T) -> (B, C, T * prod(scales)).
# ---------------------------------------------------------------------------
def upsample_network_apply(c, *, upsample_scales, conv_weights,
                           frame_block=None, row_block=None, use_matmul=None,
                           out_dtype=jnp.float32):
    B, C, T = c.shape
    scales = [int(s) for s in upsample_scales]
    P = int(np.prod(scales))
    L = _stencil_radius(scales)
    taps = 2 * L + 1
    R = B * C

    # --- tiling choices (all static / numpy) -------------------------------
    if frame_block is None:
        F = _choose_frame_block(T, P, L)
    else:
        F = int(frame_block)
        assert T % F == 0, "frame_block must divide T"
        assert F == T or (F * P) % 128 == 0, "output tile must be lane-dense"
        assert F >= min(T, L + 1), "frame_block too small for the stencil"
    nfb = T // F
    Kp = (F + 2 * L) + ((-(F + 2 * L)) % 8)   # contraction dim, sublane-padded

    if use_matmul is None:
        # MXU path unless the banded coefficient operand would blow VMEM.
        use_matmul = 2 * 4 * Kp * F * P <= 8 * 1024 * 1024

    R_pad = -(-R // 8) * 8
    if row_block is None:
        rb = _choose_row_block(R_pad, Kp, F, P, taps, use_matmul)
    else:
        rb = int(row_block)
        assert rb % 8 == 0 and R_pad % rb == 0
    nrb = R_pad // rb

    coef = _build_per_frame_coeffs(T, F, L, scales, conv_weights)  # (3,F,taps,P)

    # Per-frame-block coefficient variant: 0 interior, 1 first, 2 last.
    variant_ids = np.zeros((nfb,), dtype=np.int32)
    variant_ids[-1] = 2
    variant_ids[0] = 1

    # --- small input-side layout work (input is P x smaller than output) ---
    x = c.reshape(R, T).astype(jnp.float32)
    xp = jnp.pad(x, ((0, R_pad - R), (L, L + (Kp - (F + 2 * L)))))  # (R_pad, T+Kp-F)
    # Overlapping per-block frame windows: xwin[f] = xp[:, f*F : f*F + Kp]
    col_idx = np.arange(nfb)[:, None] * F + np.arange(Kp)[None, :]
    xwin = jnp.transpose(xp[:, col_idx], (1, 0, 2))                 # (nfb, R_pad, Kp)

    if use_matmul:
        coef_arr = jnp.asarray(_build_band_matrices(coef, Kp))      # (3, Kp, F*P)
        coef_spec = pl.BlockSpec((1, Kp, F * P), lambda r, f, vids: (vids[f], 0, 0))
        kernel = _upsample_matmul_kernel
    else:
        # TODO(synk): fallback unrolls F*taps FMAs; only used when the banded
        #             MXU operand would not fit VMEM (pathological T).
        coef_arr = jnp.asarray(coef.reshape(3, F * taps, P))        # (3, F*taps, P)
        coef_spec = pl.BlockSpec((1, F * taps, P), lambda r, f, vids: (vids[f], 0, 0))
        kernel = functools.partial(_upsample_taps_kernel, F=F, taps=taps, P=P)

    grid_spec = pltpu.PrefetchScalarGridSpec(
        num_scalar_prefetch=1,
        grid=(nrb, nfb),
        in_specs=[
            pl.BlockSpec((1, rb, Kp), lambda r, f, vids: (f, r, 0)),
            coef_spec,
        ],
        out_specs=pl.BlockSpec((rb, F * P), lambda r, f, vids: (r, f)),
    )

    y = pl.pallas_call(
        kernel,
        out_shape=jax.ShapeDtypeStruct((R_pad, T * P), out_dtype),
        grid_spec=grid_spec,
        compiler_params=pltpu.CompilerParams(
            dimension_semantics=("parallel", "parallel")),
    )(jnp.asarray(variant_ids), xwin, coef_arr)

    if R_pad != R:
        # TODO(synk): this slice costs one extra pass over the output; choose
        # B*C as a multiple of 8 to avoid it.
        y = y[:R]
    return y.reshape(B, C, T * P)


# ---------------------------------------------------------------------------
# Self-test.
# ---------------------------------------------------------------------------
if __name__ == "__main__":
    k1, k2 = jax.random.split(jax.random.PRNGKey(0))

    # Test 1: toy config (2 layers, total upsample 6); single frame block,
    # full-width output tile, MXU path.
    upsample_scales = (2, 3)
    B, C, T = 2, 8, 16
    c = jax.random.normal(k1, (B, C, T), dtype=jnp.float32)
    conv_weights = init_upsample_params(upsample_scales)
    fn = jax.jit(functools.partial(upsample_network_apply,
                                   upsample_scales=upsample_scales,
                                   conv_weights=conv_weights))
    out = jax.block_until_ready(fn(c))
    assert out.shape == (B, C, T * int(np.prod(upsample_scales))), out.shape
    ref = upsample_network_ref(np.asarray(c), upsample_scales, conv_weights)
    np.testing.assert_allclose(np.asarray(out), ref, rtol=1e-4, atol=1e-5)

    # Test 2: multi frame-block grid (exercises interior/first/last coefficient
    # variants via the scalar-prefetch index_map, lane-dense 128-wide tiles and
    # row padding R=5), MXU banded-matmul path.
    upsample_scales2 = (4, 4)
    B2, C2, T2 = 1, 5, 64
    c2 = jax.random.normal(k2, (B2, C2, T2), dtype=jnp.float32)
    conv_weights2 = init_upsample_params(upsample_scales2)
    fn2 = jax.jit(functools.partial(upsample_network_apply,
                                    upsample_scales=upsample_scales2,
                                    conv_weights=conv_weights2,
                                    frame_block=8))
    out2 = jax.block_until_ready(fn2(c2))
    assert out2.shape == (B2, C2, T2 * int(np.prod(upsample_scales2))), out2.shape
    ref2 = upsample_network_ref(np.asarray(c2), upsample_scales2, conv_weights2)
    np.testing.assert_allclose(np.asarray(out2), ref2, rtol=1e-4, atol=1e-5)

    # Test 3: same config forced through the VPU tap-loop fallback path.
    fn3 = jax.jit(functools.partial(upsample_network_apply,
                                    upsample_scales=upsample_scales2,
                                    conv_weights=conv_weights2,
                                    frame_block=8, use_matmul=False))
    out3 = jax.block_until_ready(fn3(c2))
    np.testing.assert_allclose(np.asarray(out3), ref2, rtol=1e-4, atol=1e-5)

    print("KERNEL_OK")
</pallas_src>

<mosaic_0001>
module attributes {stable_mosaic.version = 11 : i64} {
  func.func @_upsample_matmul_kernel(%arg0: i32, %arg1: i32, %arg2: memref<1xi32, #tpu.memory_space<smem>>, %arg3: memref<1x16x24xf32, #tpu.memory_space<vmem>>, %arg4: memref<1x24x96xf32, #tpu.memory_space<vmem>>, %arg5: memref<16x96xf32, #tpu.memory_space<vmem>>) attributes {dimension_semantics = [#tpu.dimension_semantics<parallel>, #tpu.dimension_semantics<parallel>], iteration_bounds = array<i64: 1, 1>, scalar_prefetch = 1 : i64, scratch_operands = 0 : i64, tpu.core_type = #tpu.core_type<tc>, window_params = [{transform_indices = @transform_0, window_bounds = array<i64: 1, 16, 24>}, {transform_indices = @transform_1, window_bounds = array<i64: 1, 24, 96>}, {transform_indices = @transform_2, window_bounds = array<i64: 16, 96>}]} {
    %c0 = arith.constant 0 : index
    %c0_0 = arith.constant 0 : index
    %c0_1 = arith.constant 0 : index
    %0 = vector.load %arg3[%c0, %c0_0, %c0_1] : memref<1x16x24xf32, #tpu.memory_space<vmem>>, vector<1x16x24xf32>
    %1 = vector.shape_cast %0 : vector<1x16x24xf32> to vector<16x24xf32>
    %c0_2 = arith.constant 0 : index
    %c0_3 = arith.constant 0 : index
    %c0_4 = arith.constant 0 : index
    %2 = vector.load %arg4[%c0_2, %c0_3, %c0_4] : memref<1x24x96xf32, #tpu.memory_space<vmem>>, vector<1x24x96xf32>
    %3 = vector.shape_cast %2 : vector<1x24x96xf32> to vector<24x96xf32>
    %cst = arith.constant dense<0.000000e+00> : vector<16x96xf32>
    %4 = tpu.matmul %1, %3, %cst {dimension_numbers = #tpu.dot_dimension_numbers<[1], [0], [0], [1], [0, 0, 1, 1], [], []>, precision = #tpu.contract_precision<fp32>} : vector<16x24xf32>, vector<24x96xf32>, vector<16x96xf32> -> vector<16x96xf32>
    %c0_5 = arith.constant 0 : index
    %c0_6 = arith.constant 0 : index
    %5 = vector.load %arg5[%c0_5, %c0_6] : memref<16x96xf32, #tpu.memory_space<vmem>>, vector<16x96xf32>
    tpu.vector_store %arg5[%c0_5, %c0_6], %4 {strides = array<i32>} : memref<16x96xf32, #tpu.memory_space<vmem>>, vector<16x96xf32>,
    return
  }
  func.func @transform_0(%arg0: i32, %arg1: i32, %arg2: memref<1xi32, #tpu.memory_space<smem>>) -> (i32, i32, i32) {
    %c0_i32 = arith.constant 0 : i32
    %c0_i32_0 = arith.constant 0 : i32
    return %arg1, %arg0, %c0_i32 : i32, i32, i32
  }
  func.func @transform_1(%arg0: i32, %arg1: i32, %arg2: memref<1xi32, #tpu.memory_space<smem>>) -> (i32, i32, i32) {
    %0 = arith.index_cast %arg1 : i32 to index
    %1 = memref.load %arg2[%0] : memref<1xi32, #tpu.memory_space<smem>>
    %c0_i32 = arith.constant 0 : i32
    %c0_i32_0 = arith.constant 0 : i32
    %c0_i32_1 = arith.constant 0 : i32
    return %1, %c0_i32, %c0_i32_0 : i32, i32, i32
  }
  func.func @transform_2(%arg0: i32, %arg1: i32, %arg2: memref<1xi32, #tpu.memory_space<smem>>) -> (i32, i32) {
    %c0_i32 = arith.constant 0 : i32
    return %arg0, %arg1 : i32, i32
  }
}

</mosaic_0001>

<bundles_post_ra>
// kernel: upsample_network_apply.1
= control target key start
LH: loop header
LB: loop body
LE: loop exit
PB: predicated region body
PF: predicated region fallthrough
CT: control target
= control target key end

     0   :  { %vm39_vm0 = vcmask 195584   ;;  %s800_s0 = inlined_call_operand.<no memory space> [shape: s32[1], index: 0, kind: input, shape index: {}]   ;;  %s801_s1 = inlined_call_operand.vmem [shape: f32[1,16,24], index: 1, kind: input, shape index: {}]   ;;  %s802_s2 = inlined_call_operand.vmem [shape: f32[3,24,96], index: 2, kind: input, shape index: {}]   ;;  %s803_s3 = inlined_call_operand.hbm [shape: f32[16,96], index: 3, kind: output, shape index: {}]  }
   0x1   :  { %p28_p0 = scmp.lt.s32.totalorder %s800_s0, 2  ;;  %v34_v0 = vld [vmem:[%s801_s1] sm:$0xff]  ;;  %v35_v1 = vld [vmem:[%s801_s1 + $0x8] sm:$0xff] }
   0x2   :  { %9 = vsyncpa [#allocation5], 0  ;;  %v41_v2 = vsel %vm39_vm0, %v34_v0, 0  ;;  %v44_v3 = vsel %vm39_vm0, %v35_v1, 0  ;;  %vm561_vm1 = vcmask 785408  }
   0x3   :  { %s805_s0 = smov (!%p28_p0, %s800_s0), 2  ;;  %v768_v4 = vand.u32 4294901760, %v41_v2  ;;  %v770_v5 = vand.u32 4294901760, %v44_v3 }
   0x4   :  { %s705_s20 = smul.u32 24, %s805_s0  ;;  %s733_s0 = smov [#allocation4]  }
   0x5   :  { %v115_v6 = vsub.f32 %v41_v2, %v768_v4  ;;  %v774_v7 = vsub.f32 %v44_v3, %v770_v5 }
   0x6   :  { %s32_s22 = scalar_lea.vmem %s802_s2, %s705_s20  ;;  %s569_s2 = sshll.u32 %s733_s0, 4  ;;  %s570_s2 = int_to_ptr.vmem [resolvable:$true] %s569_s2 }
   0x7   :  { %v116_v8 = vand.u32 4294901760, %v115_v6  ;;  %v126_v9 = vand.u32 4294901760, %v774_v7  ;;  %v36_v10 = vld [vmem:[%s32_s22] sm:$0xff]  ;;  %v37_v11 = vld [vmem:[%s32_s22 + $0x8] sm:$0xff]  ;;  %v38_v12 = vld [vmem:[%s32_s22 + $0x10] sm:$0xff]  ;;  %s709_s23 = scalar_lea.vmem %s570_s2, 256  ;;  %p714_p2 = scmp.lt.s32.totalorder %s570_s2, %s570_s2 }
   0x8   :  { %v47_v13 = vand.u32 4294901760, %v36_v10  ;;  %v50_v14 = vand.u32 4294901760, %v37_v11  ;;  %v53_v15 = vand.u32 4294901760, %v38_v12  ;;  %p710_p1 = scmp.ne.s32.totalorder %s570_s2, %s709_s23  ;;  %p715_p3 = scmp.lt.s32.totalorder %s709_s23, %s709_s23 }
   0x9   :  { %v117_v16 = vsub.f32 %v115_v6, %v116_v8  ;;  %650 = vmatprep.mubr.f32.mxu0 %v116_v8  ;;  %v127_v18 = vsub.f32 %v774_v7, %v126_v9 }
   0xa   :  { %v671_v17 = vpack.c.bf16 %v50_v14, %v47_v13  ;;  %v136_v19 = vsub.f32 %v36_v10, %v47_v13  ;;  %v143_v20 = vsub.f32 %v37_v11, %v50_v14  ;;  %v150_v22 = vsub.f32 %v38_v12, %v53_v15  ;;  %p716_p4 = por %p715_p3, %p714_p2 }
   0xb   :  { %v118_v21 = vand.u32 4294901760, %v117_v16  ;;  %v128_v26 = vand.u32 4294901760, %v127_v18 }
   0xc   :  { %672 = vmatprep.subr.bf16.mxu1 %v671_v17  ;;  %684 = vmatprep.subr.bf16.mxu0 %v671_v17  ;;  %v137_v23 = vand.u32 4294901760, %v136_v19  ;;  %v144_v24 = vand.u32 4294901760, %v143_v20  ;;  %v151_v25 = vand.u32 4294901760, %v150_v22  ;;  %v679_v35 = vpack.c.bf16 %v143_v20, %v136_v19  ;;  %p717_p5 = pnand %p716_p4, %p710_p1 }
   0xd   :  { %674 = vmatpush3.bf16.msra.mxu1 %v671_v17  ;;  %686 = vmatpush3.bf16.msra.mxu0 %v671_v17 }
   0xe   :  { %621 = vmatprep.subr.mxu1 %v53_v15  ;;  %648 = vmatprep.subr.mxu0 %v53_v15  ;;  %v138_v27 = vsub.f32 %v136_v19, %v137_v23  ;;  %v145_v28 = vsub.f32 %v143_v20, %v144_v24  ;;  %v687_v29 = vpack.c.bf16 %v144_v24, %v137_v23 }
   0xf   :  { %623 = vmatprep.mubr.f32.mxu1 %v118_v21  ;;  %v152_v30 = vsub.f32 %v150_v22, %v151_v25 }
  0x10   :  { %v139_v31 = vand.u32 4294901760, %v138_v27  ;;  %v146_v32 = vand.u32 4294901760, %v145_v28 }
  0x11   :  { %622 = vmatpush3.msra.mxu1 %v53_v15  ;;  %649 = vmatpush3.msra.mxu0 %v53_v15  ;;  %v153_v34 = vand.u32 4294901760, %v152_v30 }
  0x12   :  { %624 = vmatmul.mubr.f32.vlgmr.msra.gmra.mrb[0].mxu1 %v128_v26  ;;  %651 = vmatmul.mubr.f32.vlgmr.msra.gmra.mrb[0].mxu0 %v126_v9  ;;  %v675_v33 = vpack.c.bf16 %v146_v32, %v139_v31 }
  0x13   :  { %688 = vmatprep.subr.bf16.mxu0 %v687_v29  ;;  %632 = vmatprep.mubr.f32.mxu1 %v768_v4 }
  0x14   :  { %676 = vmatprep.subr.bf16.mxu1 %v675_v33  ;;  %690 = vmatpush3.bf16.msra.mxu0 %v687_v29 }
  0x15   :  { %678 = vmatpush3.bf16.msra.mxu1 %v675_v33  ;;  %657 = vmatprep.subr.mxu0 %v151_v25 }
  0x16   :  { %630 = vmatprep.subr.mxu1 %v153_v34  ;;  %659 = vmatprep.mubr.f32.mxu0 %v768_v4 }
  0x18   :  { %658 = vmatpush3.msra.mxu0 %v151_v25 }
  0x19   :  { %631 = vmatpush3.msra.mxu1 %v153_v34  ;;  %692 = vmatprep.subr.bf16.mxu0 %v671_v17 }
  0x1a   :  { %633 = vmatmul.mubr.f32.vlgmr.msra.gmra.mrb[0].mxu1 %v770_v5  ;;  %660 = vmatmul.mubr.f32.vlgmr.msra.gmra.mrb[0].mxu0 %v770_v5 }
  0x1b   :  { %680 = vmatprep.subr.bf16.mxu1 %v679_v35  ;;  %694 = vmatpush3.bf16.msra.mxu0 %v671_v17 }
  0x1c   :  { %682 = vmatpush3.bf16.msra.mxu1 %v679_v35  ;;  %666 = vmatprep.subr.mxu0 %v53_v15 }
  0x1d   :  { %639 = vmatprep.subr.mxu1 %v150_v22  ;;  %641 = vmatprep.mubr.f32.mxu1 %v115_v6 }
  0x1e   :  { %668 = vmatprep.mubr.f32.mxu0 %v768_v4 }
  0x1f   :  { %667 = vmatpush3.msra.mxu0 %v53_v15 }
  0x20   :  { %640 = vmatpush3.msra.mxu1 %v150_v22 }
  0x22   :  { %642 = vmatmul.mubr.f32.vlgmr.msra.gmra.mrb[0].mxu1 %v774_v7  ;;  %669 = vmatmul.mubr.f32.vlgmr.msra.gmra.mrb[0].mxu0 %v770_v5 }
  0xf5   :  { %v643_v36 = vpop.f32.mrb[0].mxu1  ;;  %v670_v37 = vpop.f32.mrb[0].mxu0 }
  0xf6   :  { %v695_v38 = vadd.f32 %v670_v37, %v643_v36  ;;  %v300_v39 = vpop.f32.mrb[1].mxu1  ;;  %v551_v40 = vpop.f32.mrb[1].mxu0 }
  0xf7   :  { %v696_v41 = vadd.f32 %v551_v40, %v300_v39 }
  0xf8   :  { %563 = vst.msk [vmem:[#allocation4 + $0x8] sm:$0xff] %vm561_vm1, %v695_v38 }
  0xf9   :  { %562 = vst.msk [vmem:[#allocation4] sm:$0xff] %vm561_vm1, %v696_v41 }
  0xfa   :  { %720 = shalt.err (!%p717_p5)
}
  0xfb   :  { %s721_s26 = scalar_lea.hbm %s803_s3, 256 }
  0xfc   :  { %p722_p6 = scmp.ne.s32.totalorder %s803_s3, %s721_s26  ;;  %p725_p7 = scmp.lt.u32.totalorder %s721_s26, %s803_s3 }
  0xfe   :  { %p727_p8 = pnand %p725_p7, %p722_p6 }
 0x100   :  { %730 = shalt.err (!%p727_p8)
}
 0x101   :  { %s734_s4 = smov 128   ;;  %s735_s5 = smov 8  }
 0x102   :  { %575 = dma.vmem_to_hbm [thread:$0]  %s570_s2, 256, %s803_s3, [#allocation5], %s734_s4, %s734_s4, %s735_s5  }
 0x103   :  { %731 = dma.done.wait [#allocation5], 256  }
 0x104   :  { %732 = vsyncadd [#allocation5], 4294967040 }
 0x105   :  { %579 = vsyncpa [#allocation5], 1 }

</bundles_post_ra>
